<compile_context>
chip_gen: v7x
topology: tpu7x:2x2x1
jax: 0.10.0
libtpu: 0.0.40
codegen_flags: <defaults>
</compile_context>

<pallas_src>
import functools

import jax
import jax.numpy as jnp
from jax import lax
from jax.experimental import pallas as pl
from jax.experimental.pallas import tpu as pltpu

_LANE = 128
_SUBLANE = 8
_MiB = 1024 * 1024


def _round_up(v, m):
    return ((v + m - 1) // m) * m


def _vmem_limit_bytes():
    """Generation-aware scoped-VMEM limit (v7x: ~48 MiB; v5e/v6e: 64 MiB)."""
    cap = 64 * _MiB  # conservative fallback (v7x per-TC VMEM)
    try:
        info = pltpu.get_tpu_info()
        cap = int(getattr(info, "vmem_capacity_bytes", cap) or cap)
    except Exception:
        pass
    return min(3 * cap // 4, 64 * _MiB)


def _choose_tiles(R, S, vmem_limit, block_elems=None):
    """Pick (r_tile, n_r_tiles, chunk, n_chunks).

    Targets ~vmem_limit/6 bytes of f32-equivalent per input block (double-buffered
    input + any f32 upcast temp stays well under the limit), keeps last-tile row
    padding <= 7 rows, and uses >= 2 row tiles whenever R >= 16 so the 'parallel'
    row axis can be sharded across v7x's two TensorCores.
    """
    r_aligned = _round_up(R, _SUBLANE)
    s_aligned = _round_up(S, _LANE)

    if block_elems is None:
        block_elems = (vmem_limit // 6) // 4          # elems of f32-equivalent
    target_elems = max(_SUBLANE * _LANE, block_elems)

    # Row-tile cap: modest when S is wide (chunk carries the block size), larger when
    # S is narrow so blocks stay multi-MiB; bounded to keep the accumulator small.
    max_r_tile = min(2048, max(256, _round_up(target_elems // s_aligned, _SUBLANE)))
    min_tiles = 2 if r_aligned >= 2 * _SUBLANE else 1
    n_r_tiles = max(min_tiles, pl.cdiv(r_aligned, max_r_tile))
    r_tile = _round_up(pl.cdiv(r_aligned, n_r_tiles), _SUBLANE)
    n_r_tiles = pl.cdiv(R, r_tile)

    chunk = min(s_aligned, max(_LANE, (target_elems // r_tile) // _LANE * _LANE))
    n_chunks = pl.cdiv(S, chunk)
    return r_tile, n_r_tiles, chunk, n_chunks


def _gap_kernel(x_ref, o_ref, acc_ref, *, inv_total, n_chunks, chunk, tail):
    """Grid = (row_tiles, chunks); reduction axis last ('arbitrary')."""
    k = pl.program_id(1)

    @pl.when(k == 0)
    def _init():
        acc_ref[...] = jnp.zeros_like(acc_ref)

    def full_chunk_sum():
        x = x_ref[...].astype(jnp.float32)
        return jnp.sum(x, axis=-1, keepdims=True)

    def tail_chunk_sum():
        # Only the first `tail` columns of the final chunk are valid; the rest of the
        # VMEM block is stale/undefined (edge-block DMA is clipped to the array).
        r_tile = x_ref.shape[0]
        t0 = (tail // _LANE) * _LANE          # lane-aligned valid prefix
        rem = tail - t0                        # 0..127 valid lanes in the last tile
        s = jnp.zeros((r_tile, 1), jnp.float32)
        if t0 > 0:
            s = s + jnp.sum(x_ref[:, :t0].astype(jnp.float32), axis=-1, keepdims=True)
        if rem > 0:
            xt = x_ref[:, t0:t0 + _LANE].astype(jnp.float32)
            lane = lax.broadcasted_iota(jnp.int32, xt.shape, 1)
            s = s + jnp.sum(jnp.where(lane < rem, xt, 0.0), axis=-1, keepdims=True)
        return s

    if tail == chunk:
        # S is a multiple of chunk: every block is fully valid, no masking anywhere.
        acc_ref[...] += full_chunk_sum()
    else:
        if n_chunks > 1:
            @pl.when(k < n_chunks - 1)
            def _body():
                acc_ref[...] += full_chunk_sum()

        @pl.when(k == n_chunks - 1)
        def _tail():
            acc_ref[...] += tail_chunk_sum()

    @pl.when(k == n_chunks - 1)
    def _finalize():
        # One scale per row tile; rows beyond R in the last row tile are clipped
        # on writeback, so their garbage sums never reach HBM.
        o_ref[...] = (acc_ref[...] * inv_total).astype(o_ref.dtype)


def global_avg_pool_3d(x, axis=(2, 3, 4), mask=None, *, block_elems=None):
    """Mean over spatial axes (2, 3, 4) of an NCDHW tensor, computed in Pallas."""
    assert tuple(axis) == (2, 3, 4), "kernel specialised for axis=(2,3,4)"
    del mask  # unused by the reference module's forward
    N, C, D, H, W = x.shape
    R, S = N * C, D * H * W

    vmem_limit = _vmem_limit_bytes()
    r_tile, n_r_tiles, chunk, n_chunks = _choose_tiles(R, S, vmem_limit, block_elems)
    tail = S - (n_chunks - 1) * chunk          # valid columns in the last chunk

    # Contiguous-dim collapse: metadata-only reshape, no HBM copy (and no padding).
    x2 = x.reshape(R, S)

    kernel = functools.partial(
        _gap_kernel,
        inv_total=1.0 / float(S),
        n_chunks=n_chunks,
        chunk=chunk,
        tail=tail,
    )

    out = pl.pallas_call(
        kernel,
        out_shape=jax.ShapeDtypeStruct((R, 1), x.dtype),
        grid_spec=pltpu.PrefetchScalarGridSpec(
            num_scalar_prefetch=0,
            grid=(n_r_tiles, n_chunks),
            in_specs=[pl.BlockSpec((r_tile, chunk), lambda r, k: (r, k))],
            out_specs=pl.BlockSpec((r_tile, 1), lambda r, k: (r, 0)),
            scratch_shapes=[pltpu.VMEM((r_tile, 1), jnp.float32)],
        ),
        compiler_params=pltpu.CompilerParams(
            dimension_semantics=("parallel", "arbitrary"),
            vmem_limit_bytes=vmem_limit,
        ),
    )(x2)

    return out[:, 0].reshape(N, C)


if __name__ == "__main__":
    # 1) Fully aligned shapes: no masking path at all.
    x = jax.random.normal(jax.random.PRNGKey(0), (2, 4, 8, 8, 8), dtype=jnp.float32)
    y = jax.block_until_ready(global_avg_pool_3d(x))
    y_ref = jnp.mean(x, axis=(2, 3, 4))
    assert y.shape == (2, 4)
    assert jnp.allclose(y, y_ref, atol=1e-5, rtol=1e-5)

    # 2) Non-lane-aligned S and non-sublane-aligned R: single chunk with
    #    lane-aligned prefix + iota-masked last lane tile; row-tail clipping.
    x2 = jax.random.normal(jax.random.PRNGKey(1), (2, 3, 5, 7, 6), dtype=jnp.float32)
    y2 = jax.block_until_ready(global_avg_pool_3d(x2))
    assert y2.shape == (2, 3)
    assert jnp.allclose(y2, jnp.mean(x2, axis=(2, 3, 4)), atol=1e-5, rtol=1e-5)

    # 3) Force a multi-chunk reduction (small block budget) with a masked tail chunk.
    x3 = jax.random.normal(jax.random.PRNGKey(2), (2, 3, 8, 10, 12), dtype=jnp.float32)
    y3 = jax.block_until_ready(global_avg_pool_3d(x3, block_elems=2048))
    assert y3.shape == (2, 3)
    assert jnp.allclose(y3, jnp.mean(x3, axis=(2, 3, 4)), atol=1e-5, rtol=1e-5)

    # 4) Multiple row tiles (megacore split) with a ragged row tail and a tail chunk
    #    that is entirely within one masked lane tile.
    x4 = jax.random.normal(jax.random.PRNGKey(3), (3, 7, 4, 4, 4), dtype=jnp.float32)
    y4 = jax.block_until_ready(global_avg_pool_3d(x4))
    assert y4.shape == (3, 7)
    assert jnp.allclose(y4, jnp.mean(x4, axis=(2, 3, 4)), atol=1e-5, rtol=1e-5)

    print("KERNEL_OK")
</pallas_src>

<mosaic_0001>
module attributes {stable_mosaic.version = 11 : i64} {
  func.func @_gap_kernel(%arg0: i32, %arg1: i32, %arg2: memref<8x512xf32, #tpu.memory_space<vmem>>, %arg3: memref<8x1xf32, #tpu.memory_space<vmem>>, %arg4: memref<8x1xf32, #tpu.memory_space<vmem>>) attributes {dimension_semantics = [#tpu.dimension_semantics<parallel>, #tpu.dimension_semantics<arbitrary>], iteration_bounds = array<i64: 1, 1>, scalar_prefetch = 0 : i64, scratch_operands = 1 : i64, tpu.core_type = #tpu.core_type<tc>, window_params = [{transform_indices = @transform_0, window_bounds = array<i64: 8, 512>}, {transform_indices = @transform_1, window_bounds = array<i64: 8, 1>}]} {
    %c0_i32 = arith.constant 0 : i32
    %0 = arith.cmpi eq, %arg1, %c0_i32 : i32
    %1 = arith.extui %0 : i1 to i32
    %c0_i32_0 = arith.constant 0 : i32
    %2 = arith.cmpi ne, %1, %c0_i32_0 : i32
    scf.if %2 {
      %cst_8 = arith.constant 0.000000e+00 : f32
      %12 = vector.broadcast %cst_8 : f32 to vector<8x1xf32>
      %c0_9 = arith.constant 0 : index
      %c0_10 = arith.constant 0 : index
      %13 = vector.load %arg4[%c0_9, %c0_10] : memref<8x1xf32, #tpu.memory_space<vmem>>, vector<8x1xf32>
      tpu.vector_store %arg4[%c0_9, %c0_10], %12 {strides = array<i32>} : memref<8x1xf32, #tpu.memory_space<vmem>>, vector<8x1xf32>,
    } else {
    }
    %c0 = arith.constant 0 : index
    %c0_1 = arith.constant 0 : index
    %3 = vector.load %arg4[%c0, %c0_1] : memref<8x1xf32, #tpu.memory_space<vmem>>, vector<8x1xf32>
    %c0_2 = arith.constant 0 : index
    %c0_3 = arith.constant 0 : index
    %4 = vector.load %arg2[%c0_2, %c0_3] : memref<8x512xf32, #tpu.memory_space<vmem>>, vector<8x512xf32>
    %cst = arith.constant dense<0.000000e+00> : vector<8xf32>
    %5 = vector.multi_reduction <add>, %4, %cst [1] : vector<8x512xf32> to vector<8xf32>
    %6 = vector.shape_cast %5 : vector<8xf32> to vector<8x1xf32>
    %7 = arith.addf %3, %6 : vector<8x1xf32>
    %c0_4 = arith.constant 0 : index
    %c0_5 = arith.constant 0 : index
    %8 = vector.load %arg4[%c0_4, %c0_5] : memref<8x1xf32, #tpu.memory_space<vmem>>, vector<8x1xf32>
    tpu.vector_store %arg4[%c0_4, %c0_5], %7 {strides = array<i32>} : memref<8x1xf32, #tpu.memory_space<vmem>>, vector<8x1xf32>,
    %c0_i32_6 = arith.constant 0 : i32
    %9 = arith.cmpi eq, %arg1, %c0_i32_6 : i32
    %10 = arith.extui %9 : i1 to i32
    %c0_i32_7 = arith.constant 0 : i32
    %11 = arith.cmpi ne, %10, %c0_i32_7 : i32
    scf.if %11 {
      %c0_8 = arith.constant 0 : index
      %c0_9 = arith.constant 0 : index
      %12 = vector.load %arg4[%c0_8, %c0_9] : memref<8x1xf32, #tpu.memory_space<vmem>>, vector<8x1xf32>
      %cst_10 = arith.constant 0.001953125 : f32
      %13 = vector.broadcast %cst_10 : f32 to vector<8x1xf32>
      %14 = arith.mulf %12, %13 : vector<8x1xf32>
      %c0_11 = arith.constant 0 : index
      %c0_12 = arith.constant 0 : index
      %15 = vector.load %arg3[%c0_11, %c0_12] : memref<8x1xf32, #tpu.memory_space<vmem>>, vector<8x1xf32>
      tpu.vector_store %arg3[%c0_11, %c0_12], %14 {strides = array<i32>} : memref<8x1xf32, #tpu.memory_space<vmem>>, vector<8x1xf32>,
    } else {
    }
    return
  }
  func.func @transform_0(%arg0: i32, %arg1: i32) -> (i32, i32) {
    %c0_i32 = arith.constant 0 : i32
    return %arg0, %arg1 : i32, i32
  }
  func.func @transform_1(%arg0: i32, %arg1: i32) -> (i32, i32) {
    %c0_i32 = arith.constant 0 : i32
    %c0_i32_0 = arith.constant 0 : i32
    return %arg0, %c0_i32 : i32, i32
  }
}

</mosaic_0001>

<bundles_post_ra>
// kernel: tpu_custom_call.1
= control target key start
LH: loop header
LB: loop body
LE: loop exit
PB: predicated region body
PF: predicated region fallthrough
CT: control target
= control target key end

     0   :  { %6 = vsyncpa [#allocation4], 0  ;;  %s76_s6 = smov [#allocation3]   ;;  %s106_s0 = inlined_call_operand.hbm [shape: f32[8,512], index: 0, kind: input, shape index: {}]   ;;  %s107_s1 = inlined_call_operand.vmem [shape: f32[8,1], index: 1, kind: output, shape index: {}]  }
   0x1   :  { %s13_s7 = sshll.u32 %s76_s6, 4  ;;  %s52_s10 = scalar_lea.hbm %s106_s0, 512  ;;  %s14_s7 = int_to_ptr.vmem [resolvable:$true] %s13_s7 }
   0x2   :  { %p53_p0 = scmp.ne.s32.totalorder %s106_s0, %s52_s10  ;;  %p56_p1 = scmp.lt.u32.totalorder %s52_s10, %s106_s0 }
   0x4   :  { %p58_p2 = pnand %p56_p1, %p53_p0 }
   0x6   :  { %61 = shalt.err (!%p58_p2)
}
   0x7   :  { %s62_s15 = scalar_lea.vmem %s14_s7, 512  ;;  %p67_p4 = scmp.lt.s32.totalorder %s14_s7, %s14_s7 }
   0x8   :  { %p63_p3 = scmp.ne.s32.totalorder %s14_s7, %s62_s15  ;;  %p68_p5 = scmp.lt.s32.totalorder %s62_s15, %s62_s15 }
   0xa   :  { %p69_p6 = por %p68_p5, %p67_p4 }
   0xc   :  { %p70_p7 = pnand %p69_p6, %p63_p3 }
   0xe   :  { %73 = shalt.err (!%p70_p7)
}
   0xf   :  { %16 = dma.hbm_to_vmem [thread:$0]  %s106_s0, 512, %s14_s7, [#allocation4]  }
  0x10   :  { %74 = dma.done.wait [#allocation4], 512  }
  0x11   :  { %75 = vsyncadd [#allocation4], 4294966784  ;;  %vm24_vm0 = vcmask 7168   ;;  %v77_v0 = vmov 0.0   ;;  %v27_v1 = vld [vmem:[#allocation3] sm:$0xff]  ;;  %v28_v2 = vld [vmem:[#allocation3 + $0x8] sm:$0xff] }
  0x12   :  { %25 = vst.msk [vmem:[#allocation2] sm:$0xff] %vm24_vm0, %v77_v0  ;;  %v29_v3 = vld [vmem:[#allocation3 + $0x10] sm:$0xff]  ;;  %v31_v4 = vadd.f32 %v28_v2, %v27_v1  ;;  %v30_v5 = vld [vmem:[#allocation3 + $0x18] sm:$0xff] }
  0x14   :  { %v32_v6 = vadd.f32 %v31_v4, %v29_v3 }
  0x16   :  { %v33_v7 = vadd.f32 %v32_v6, %v30_v5 }
  0x18   :  { %34 = vadd.xlane.f32.xlu0 %v33_v7 }
  0x19   :  { %v26_v8 = vld [vmem:[#allocation2] sm:$0xff] }
  0xa5   :  { %v35_v9 = vpop.xlane.xlu0 %34 }
  0xa6   :  { %v36_v10 = vadd.f32 %v35_v9, %v26_v8 }
  0xa8   :  { %38 = vst.msk [vmem:[#allocation2] sm:$0xff] %vm24_vm0, %v36_v10 }
  0xaf   :  { %v42_v11 = vld [vmem:[#allocation2] sm:$0xff] }
  0xb0   :  { %v43_v12 = vmul.f32 0.001953125, %v42_v11 }
  0xb2   :  { %44 = vst.msk [vmem:[%s107_s1] sm:$0xff] %vm24_vm0, %v43_v12 }
  0xb3   :  { %49 = vsyncpa [#allocation4], 1 }

</bundles_post_ra>
